<compile_context>
chip_gen: v5e
topology: v5e:2x2
jax: 0.10.0
libtpu: 0.0.40
codegen_flags: <defaults>
</compile_context>

<pallas_src>
import math

import jax
import jax.numpy as jnp
from jax import lax
from jax.experimental import pallas as pl
from jax.experimental.pallas import tpu as pltpu


def _make_kernel(n_conv, kernel_size, batch_tile, seq_len, onehot_width, act_fn):
    """Builds the fused kernel: n_conv same-convs (+relu+mask) and a final linear."""
    half = kernel_size // 2
    TB, L = batch_tile, seq_len
    M = TB * L

    def kernel(tok_ref, mask_ref, *refs):
        o_ref = refs[-1]
        params = refs[:-1]  # [w1_stack, b1, w2_stack, b2, ..., wmap_T, bmap]

        mask = mask_ref[...].reshape(M, 1).astype(jnp.float32)          # (M, 1)
        tok = tok_ref[...].reshape(M, 1)                                 # (M, 1) int32
        # position of each flattened row inside its own sequence
        pos = lax.broadcasted_iota(jnp.int32, (TB, L, 1), 1).reshape(M, 1)

        # Embedding lookup as a masked one-hot; the embedding table itself is
        # folded into the first conv's stacked weights in the wrapper.
        onehot = lax.broadcasted_iota(jnp.int32, (M, onehot_width), 1) == tok
        x = onehot.astype(jnp.float32) * mask                            # (M, onehot_width)

        def shift_rows(v, s):
            # result[r] = v[r + s] within the same sequence, 0 outside it.
            rolled = pltpu.roll(v, shift=(-s) % M, axis=0)               # XLU sublane rotate
            valid = (pos < L - s) if s > 0 else (pos >= -s)
            return jnp.where(valid, rolled, 0.0)

        def conv_same(xin, w_ref, b_ref):
            # k-tap "same" Conv1d expressed against stacked (K*Cin, Cout) weights.
            C = xin.shape[-1]
            taps = [xin if k == half else shift_rows(xin, k - half)
                    for k in range(kernel_size)]
            if C % 128 == 0:
                # lane-aligned: one fused (M, K*C) x (K*C, Cout) MXU matmul
                lhs = jnp.concatenate(taps, axis=-1)
                y = jnp.dot(lhs, w_ref[...], preferred_element_type=jnp.float32)
            else:
                # tiny Cin (first layer = padded one-hot width): accumulate
                # per-tap matmuls against sublane-aligned weight slices.
                y = jnp.dot(taps[0], w_ref[pl.ds(0, C), :],
                            preferred_element_type=jnp.float32)
                for k in range(1, kernel_size):
                    y = y + jnp.dot(taps[k], w_ref[pl.ds(k * C, C), :],
                                    preferred_element_type=jnp.float32)
            return y + b_ref[...]

        for i in range(n_conv):
            x = conv_same(x, params[2 * i], params[2 * i + 1])
            x = act_fn(x)
            x = x * mask

        # final Linear(H, H): out = x @ W^T + b  (W^T is passed pre-transposed)
        out = jnp.dot(x, params[-2][...], preferred_element_type=jnp.float32)
        out = out + params[-1][...]
        o_ref[...] = out.reshape(o_ref.shape).astype(o_ref.dtype)

    return kernel


def rna_convolutional_network(tokens, mask, emb, conv_weights, conv_biases,
                              mapping_w, mapping_b, *, kernel_size=5, padding=2,
                              activation="relu", batch_tile=None):
    """tokens: (B, L) int ids in [0, vocab); mask: (B, L, 1) float.
    emb: (vocab, input_dim) embedding table (vocab == input_dim in the module).
    conv_weights[i]: (Cout, Cin, K) PyTorch Conv1d weights; conv_biases[i]: (Cout,).
    mapping_w: (H, H) Linear weight; mapping_b: (H,)."""
    assert kernel_size % 2 == 1 and padding == kernel_size // 2, \
        "only 'same' convolutions (odd kernel, padding = kernel_size // 2) supported"
    B, L = tokens.shape
    vocab, _ = emb.shape
    n_conv = len(conv_weights)
    H_out = mapping_w.shape[0]

    if callable(activation):
        act_fn = activation
    elif activation == "relu":
        act_fn = lambda v: jnp.maximum(v, 0.0)
    elif activation == "gelu":
        act_fn = lambda v: jax.nn.gelu(v, approximate=False)
    else:
        raise ValueError(f"unsupported activation: {activation}")

    # ---------------- host-side parameter re-layout (one time) ----------------
    vocab_pad = max(8, ((vocab + 7) // 8) * 8)     # keep per-tap slices sublane-aligned
    w_stacks, b_rows = [], []
    for i, (w, b) in enumerate(zip(conv_weights, conv_biases)):
        taps = jnp.transpose(w, (2, 1, 0)).astype(jnp.float32)     # (K, Cin, Cout)
        if i == 0:
            # fold the embedding table into the first conv's taps
            taps = jnp.einsum("vc,kco->kvo", emb.astype(jnp.float32), taps)
            taps = jnp.pad(taps, ((0, 0), (0, vocab_pad - vocab), (0, 0)))
        K_, Ci, Co = taps.shape
        w_stacks.append(taps.reshape(K_ * Ci, Co))                  # (K*Cin, Cout)
        b_rows.append(b.reshape(1, Co).astype(jnp.float32))
    wm_t = mapping_w.T.astype(jnp.float32)                          # (H_in, H_out)
    bm_row = mapping_b.reshape(1, H_out).astype(jnp.float32)

    # batch tile: fold several whole sequences into the matmul M dim per step
    if batch_tile is None:
        batch_tile = 1
        for tb in range(1, B + 1):
            if B % tb == 0 and tb * L <= 512:
                batch_tile = tb
    TB = batch_tile
    assert B % TB == 0, "batch_tile must divide batch size"

    tokens3 = tokens.astype(jnp.int32).reshape(B, L, 1)
    mask3 = mask.astype(jnp.float32).reshape(B, L, 1)

    kernel = _make_kernel(n_conv, kernel_size, TB, L, vocab_pad, act_fn)

    in_specs = [
        pl.BlockSpec((TB, L, 1), lambda b: (b, 0, 0)),   # tokens
        pl.BlockSpec((TB, L, 1), lambda b: (b, 0, 0)),   # mask
    ]
    operands = [tokens3, mask3]
    for ws, br in zip(w_stacks, b_rows):
        in_specs.append(pl.BlockSpec(ws.shape, lambda b: (0, 0)))
        in_specs.append(pl.BlockSpec(br.shape, lambda b: (0, 0)))
        operands += [ws, br]
    in_specs.append(pl.BlockSpec(wm_t.shape, lambda b: (0, 0)))
    in_specs.append(pl.BlockSpec(bm_row.shape, lambda b: (0, 0)))
    operands += [wm_t, bm_row]

    out_specs = pl.BlockSpec((TB, L, H_out), lambda b: (b, 0, 0))

    # size the scoped VMEM limit from the actual footprint (double-buffered
    # I/O blocks + broadcast weights + stacked-LHS working set), capped for v7x
    nbytes = lambda a: int(a.size) * a.dtype.itemsize
    param_bytes = sum(nbytes(a) for a in operands[2:])
    io_block_bytes = TB * L * (2 + H_out) * 4
    cmax = max([vocab_pad] + [int(w.shape[0]) for w in conv_weights] + [H_out])
    work_bytes = (kernel_size + 3) * TB * L * cmax * 4
    vmem_limit = int(min(64 * 2**20,
                         max(32 * 2**20,
                             2 * (io_block_bytes + param_bytes) + work_bytes)))

    return pl.pallas_call(
        kernel,
        out_shape=jax.ShapeDtypeStruct((B, L, H_out), jnp.float32),
        grid_spec=pltpu.PrefetchScalarGridSpec(
            num_scalar_prefetch=0,
            grid=(B // TB,),
            in_specs=in_specs,
            out_specs=out_specs,
        ),
        compiler_params=pltpu.CompilerParams(
            dimension_semantics=("parallel",),
            vmem_limit_bytes=vmem_limit),
    )(*operands)


# ---------------- reference (plain JAX, independent conv path) ----------------
def reference_forward(tokens, mask, emb, conv_ws, conv_bs, wm, bm, padding):
    x = emb[tokens] * mask
    for w, b in zip(conv_ws, conv_bs):
        y = lax.conv_general_dilated(
            x, w, window_strides=(1,), padding=((padding, padding),),
            dimension_numbers=("NLC", "OIL", "NLC"),
            precision=lax.Precision.HIGHEST)
        x = jnp.maximum(y + b, 0.0) * mask
    return jnp.dot(x, wm.T, precision=lax.Precision.HIGHEST) + bm


if __name__ == "__main__":
    # Small shapes consistent with the module (spec: input_dim=4, k=5, pad=2;
    # hidden dims kept small-but-lane-dense for the demo).
    B, L = 2, 16
    input_dim = 4
    hidden_dims = [128, 128]
    K, P = 5, 2

    key = jax.random.PRNGKey(0)
    ks = jax.random.split(key, 7)
    tokens = jax.random.randint(ks[0], (B, L), 0, input_dim, dtype=jnp.int32)
    mask = (jax.random.uniform(ks[1], (B, L, 1)) > 0.15).astype(jnp.float32)
    emb = jax.random.normal(ks[2], (input_dim, input_dim), jnp.float32)

    dims = [input_dim] + list(hidden_dims)
    conv_ws, conv_bs = [], []
    kw = jax.random.split(ks[3], len(hidden_dims))
    kb = jax.random.split(ks[4], len(hidden_dims))
    for i in range(len(hidden_dims)):
        bound = 1.0 / math.sqrt(dims[i] * K)
        conv_ws.append(jax.random.uniform(kw[i], (dims[i + 1], dims[i], K),
                                          jnp.float32, -bound, bound))
        conv_bs.append(jax.random.uniform(kb[i], (dims[i + 1],),
                                          jnp.float32, -bound, bound))
    H = hidden_dims[-1]
    bound = 1.0 / math.sqrt(H)
    wm = jax.random.uniform(ks[5], (H, H), jnp.float32, -bound, bound)
    bm = jax.random.uniform(ks[6], (H,), jnp.float32, -bound, bound)

    out = rna_convolutional_network(tokens, mask, emb, conv_ws, conv_bs, wm, bm,
                                    kernel_size=K, padding=P, activation="relu")
    out = jax.block_until_ready(out)

    ref = reference_forward(tokens, mask, emb, conv_ws, conv_bs, wm, bm, P)
    assert out.shape == (B, L, H)
    err = float(jnp.max(jnp.abs(out - ref)))
    assert jnp.allclose(out, ref, atol=2e-3, rtol=2e-3), f"max abs err {err}"
    print("KERNEL_OK")
</pallas_src>

<mosaic_0001>
module attributes {stable_mosaic.version = 11 : i64} {
  func.func @kernel(%arg0: i32, %arg1: memref<2x16x1xi32, #tpu.memory_space<vmem>>, %arg2: memref<2x16x1xf32, #tpu.memory_space<vmem>>, %arg3: memref<40x128xf32, #tpu.memory_space<vmem>>, %arg4: memref<1x128xf32, #tpu.memory_space<vmem>>, %arg5: memref<640x128xf32, #tpu.memory_space<vmem>>, %arg6: memref<1x128xf32, #tpu.memory_space<vmem>>, %arg7: memref<128x128xf32, #tpu.memory_space<vmem>>, %arg8: memref<1x128xf32, #tpu.memory_space<vmem>>, %arg9: memref<2x16x128xf32, #tpu.memory_space<vmem>>) attributes {dimension_semantics = [#tpu.dimension_semantics<parallel>], iteration_bounds = array<i64: 1>, scalar_prefetch = 0 : i64, scratch_operands = 0 : i64, tpu.core_type = #tpu.core_type<tc>, window_params = [{transform_indices = @transform_0, window_bounds = array<i64: 2, 16, 1>}, {transform_indices = @transform_1, window_bounds = array<i64: 2, 16, 1>}, {pipeline_mode = #tpu.pipeline_mode<synchronous>, transform_indices = @transform_2, window_bounds = array<i64: 40, 128>}, {pipeline_mode = #tpu.pipeline_mode<synchronous>, transform_indices = @transform_3, window_bounds = array<i64: 1, 128>}, {pipeline_mode = #tpu.pipeline_mode<synchronous>, transform_indices = @transform_4, window_bounds = array<i64: 640, 128>}, {pipeline_mode = #tpu.pipeline_mode<synchronous>, transform_indices = @transform_5, window_bounds = array<i64: 1, 128>}, {pipeline_mode = #tpu.pipeline_mode<synchronous>, transform_indices = @transform_6, window_bounds = array<i64: 128, 128>}, {pipeline_mode = #tpu.pipeline_mode<synchronous>, transform_indices = @transform_7, window_bounds = array<i64: 1, 128>}, {transform_indices = @transform_8, window_bounds = array<i64: 2, 16, 128>}]} {
    %c0 = arith.constant 0 : index
    %c0_0 = arith.constant 0 : index
    %c0_1 = arith.constant 0 : index
    %0 = vector.load %arg2[%c0, %c0_0, %c0_1] : memref<2x16x1xf32, #tpu.memory_space<vmem>>, vector<2x16x1xf32>
    %1 = vector.shape_cast %0 : vector<2x16x1xf32> to vector<32x1xf32>
    %c0_2 = arith.constant 0 : index
    %c0_3 = arith.constant 0 : index
    %c0_4 = arith.constant 0 : index
    %2 = vector.load %arg1[%c0_2, %c0_3, %c0_4] : memref<2x16x1xi32, #tpu.memory_space<vmem>>, vector<2x16x1xi32>
    %3 = vector.shape_cast %2 : vector<2x16x1xi32> to vector<32x1xi32>
    %4 = tpu.iota {dimensions = array<i32: 1>} : vector<2x16x1xi32>
    %5 = vector.shape_cast %4 : vector<2x16x1xi32> to vector<32x1xi32>
    %6 = tpu.iota {dimensions = array<i32: 1>} : vector<32x8xi32>
    %7 = vector.broadcast %3 : vector<32x1xi32> to vector<32x8xi32>
    %8 = arith.cmpi eq, %6, %7 : vector<32x8xi32>
    %9 = arith.extui %8 : vector<32x8xi1> to vector<32x8xi32>
    %10 = arith.sitofp %9 : vector<32x8xi32> to vector<32x8xf32>
    %11 = vector.broadcast %1 : vector<32x1xf32> to vector<32x8xf32>
    %12 = arith.mulf %10, %11 : vector<32x8xf32>
    %c2_i32 = arith.constant 2 : i32
    %13 = tpu.dynamic_rotate %12 by %c2_i32 dim 0 : vector<32x8xf32>, i32 -> vector<32x8xf32>
    %c2_i32_5 = arith.constant 2 : i32
    %14 = vector.broadcast %c2_i32_5 : i32 to vector<32x1xi32>
    %15 = arith.cmpi sge, %5, %14 : vector<32x1xi32>
    %cst = arith.constant 0.000000e+00 : f32
    %16 = vector.shape_cast %15 : vector<32x1xi1> to vector<32x1xi1>
    %17 = vector.broadcast %16 : vector<32x1xi1> to vector<32x8xi1>
    %18 = vector.broadcast %cst : f32 to vector<32x8xf32>
    %19 = arith.select %17, %13, %18 : vector<32x8xi1>, vector<32x8xf32>
    %c1_i32 = arith.constant 1 : i32
    %20 = tpu.dynamic_rotate %12 by %c1_i32 dim 0 : vector<32x8xf32>, i32 -> vector<32x8xf32>
    %c1_i32_6 = arith.constant 1 : i32
    %21 = vector.broadcast %c1_i32_6 : i32 to vector<32x1xi32>
    %22 = arith.cmpi sge, %5, %21 : vector<32x1xi32>
    %cst_7 = arith.constant 0.000000e+00 : f32
    %23 = vector.shape_cast %22 : vector<32x1xi1> to vector<32x1xi1>
    %24 = vector.broadcast %23 : vector<32x1xi1> to vector<32x8xi1>
    %25 = vector.broadcast %cst_7 : f32 to vector<32x8xf32>
    %26 = arith.select %24, %20, %25 : vector<32x8xi1>, vector<32x8xf32>
    %c31_i32 = arith.constant 31 : i32
    %27 = tpu.dynamic_rotate %12 by %c31_i32 dim 0 : vector<32x8xf32>, i32 -> vector<32x8xf32>
    %c15_i32 = arith.constant 15 : i32
    %28 = vector.broadcast %c15_i32 : i32 to vector<32x1xi32>
    %29 = arith.cmpi slt, %5, %28 : vector<32x1xi32>
    %cst_8 = arith.constant 0.000000e+00 : f32
    %30 = vector.shape_cast %29 : vector<32x1xi1> to vector<32x1xi1>
    %31 = vector.broadcast %30 : vector<32x1xi1> to vector<32x8xi1>
    %32 = vector.broadcast %cst_8 : f32 to vector<32x8xf32>
    %33 = arith.select %31, %27, %32 : vector<32x8xi1>, vector<32x8xf32>
    %c30_i32 = arith.constant 30 : i32
    %34 = tpu.dynamic_rotate %12 by %c30_i32 dim 0 : vector<32x8xf32>, i32 -> vector<32x8xf32>
    %c14_i32 = arith.constant 14 : i32
    %35 = vector.broadcast %c14_i32 : i32 to vector<32x1xi32>
    %36 = arith.cmpi slt, %5, %35 : vector<32x1xi32>
    %cst_9 = arith.constant 0.000000e+00 : f32
    %37 = vector.shape_cast %36 : vector<32x1xi1> to vector<32x1xi1>
    %38 = vector.broadcast %37 : vector<32x1xi1> to vector<32x8xi1>
    %39 = vector.broadcast %cst_9 : f32 to vector<32x8xf32>
    %40 = arith.select %38, %34, %39 : vector<32x8xi1>, vector<32x8xf32>
    %c0_10 = arith.constant 0 : index
    %c0_11 = arith.constant 0 : index
    %41 = vector.load %arg3[%c0_10, %c0_11] : memref<40x128xf32, #tpu.memory_space<vmem>>, vector<8x128xf32>
    %cst_12 = arith.constant dense<0.000000e+00> : vector<32x128xf32>
    %42 = tpu.matmul %19, %41, %cst_12 {dimension_numbers = #tpu.dot_dimension_numbers<[1], [0], [0], [1], [0, 0, 1, 1], [], []>} : vector<32x8xf32>, vector<8x128xf32>, vector<32x128xf32> -> vector<32x128xf32>
    %c8 = arith.constant 8 : index
    %c0_13 = arith.constant 0 : index
    %43 = vector.load %arg3[%c8, %c0_13] : memref<40x128xf32, #tpu.memory_space<vmem>>, vector<8x128xf32>
    %cst_14 = arith.constant dense<0.000000e+00> : vector<32x128xf32>
    %44 = tpu.matmul %26, %43, %cst_14 {dimension_numbers = #tpu.dot_dimension_numbers<[1], [0], [0], [1], [0, 0, 1, 1], [], []>} : vector<32x8xf32>, vector<8x128xf32>, vector<32x128xf32> -> vector<32x128xf32>
    %45 = arith.addf %42, %44 : vector<32x128xf32>
    %c16 = arith.constant 16 : index
    %c0_15 = arith.constant 0 : index
    %46 = vector.load %arg3[%c16, %c0_15] : memref<40x128xf32, #tpu.memory_space<vmem>>, vector<8x128xf32>
    %cst_16 = arith.constant dense<0.000000e+00> : vector<32x128xf32>
    %47 = tpu.matmul %12, %46, %cst_16 {dimension_numbers = #tpu.dot_dimension_numbers<[1], [0], [0], [1], [0, 0, 1, 1], [], []>} : vector<32x8xf32>, vector<8x128xf32>, vector<32x128xf32> -> vector<32x128xf32>
    %48 = arith.addf %45, %47 : vector<32x128xf32>
    %c24 = arith.constant 24 : index
    %c0_17 = arith.constant 0 : index
    %49 = vector.load %arg3[%c24, %c0_17] : memref<40x128xf32, #tpu.memory_space<vmem>>, vector<8x128xf32>
    %cst_18 = arith.constant dense<0.000000e+00> : vector<32x128xf32>
    %50 = tpu.matmul %33, %49, %cst_18 {dimension_numbers = #tpu.dot_dimension_numbers<[1], [0], [0], [1], [0, 0, 1, 1], [], []>} : vector<32x8xf32>, vector<8x128xf32>, vector<32x128xf32> -> vector<32x128xf32>
    %51 = arith.addf %48, %50 : vector<32x128xf32>
    %c32 = arith.constant 32 : index
    %c0_19 = arith.constant 0 : index
    %52 = vector.load %arg3[%c32, %c0_19] : memref<40x128xf32, #tpu.memory_space<vmem>>, vector<8x128xf32>
    %cst_20 = arith.constant dense<0.000000e+00> : vector<32x128xf32>
    %53 = tpu.matmul %40, %52, %cst_20 {dimension_numbers = #tpu.dot_dimension_numbers<[1], [0], [0], [1], [0, 0, 1, 1], [], []>} : vector<32x8xf32>, vector<8x128xf32>, vector<32x128xf32> -> vector<32x128xf32>
    %54 = arith.addf %51, %53 : vector<32x128xf32>
    %c0_21 = arith.constant 0 : index
    %c0_22 = arith.constant 0 : index
    %55 = vector.load %arg4[%c0_21, %c0_22] : memref<1x128xf32, #tpu.memory_space<vmem>>, vector<1x128xf32>
    %56 = vector.broadcast %55 : vector<1x128xf32> to vector<32x128xf32>
    %57 = arith.addf %54, %56 : vector<32x128xf32>
    %cst_23 = arith.constant 0.000000e+00 : f32
    %58 = vector.broadcast %cst_23 : f32 to vector<32x128xf32>
    %59 = arith.maximumf %57, %58 : vector<32x128xf32>
    %60 = vector.broadcast %1 : vector<32x1xf32> to vector<32x128xf32>
    %61 = arith.mulf %59, %60 : vector<32x128xf32>
    %c2_i32_24 = arith.constant 2 : i32
    %62 = tpu.dynamic_rotate %61 by %c2_i32_24 dim 0 : vector<32x128xf32>, i32 -> vector<32x128xf32>
    %c2_i32_25 = arith.constant 2 : i32
    %63 = vector.broadcast %c2_i32_25 : i32 to vector<32x1xi32>
    %64 = arith.cmpi sge, %5, %63 : vector<32x1xi32>
    %cst_26 = arith.constant 0.000000e+00 : f32
    %65 = vector.shape_cast %64 : vector<32x1xi1> to vector<32x1xi1>
    %66 = vector.broadcast %65 : vector<32x1xi1> to vector<32x128xi1>
    %67 = vector.broadcast %cst_26 : f32 to vector<32x128xf32>
    %68 = arith.select %66, %62, %67 : vector<32x128xi1>, vector<32x128xf32>
    %c1_i32_27 = arith.constant 1 : i32
    %69 = tpu.dynamic_rotate %61 by %c1_i32_27 dim 0 : vector<32x128xf32>, i32 -> vector<32x128xf32>
    %c1_i32_28 = arith.constant 1 : i32
    %70 = vector.broadcast %c1_i32_28 : i32 to vector<32x1xi32>
    %71 = arith.cmpi sge, %5, %70 : vector<32x1xi32>
    %cst_29 = arith.constant 0.000000e+00 : f32
    %72 = vector.shape_cast %71 : vector<32x1xi1> to vector<32x1xi1>
    %73 = vector.broadcast %72 : vector<32x1xi1> to vector<32x128xi1>
    %74 = vector.broadcast %cst_29 : f32 to vector<32x128xf32>
    %75 = arith.select %73, %69, %74 : vector<32x128xi1>, vector<32x128xf32>
    %c31_i32_30 = arith.constant 31 : i32
    %76 = tpu.dynamic_rotate %61 by %c31_i32_30 dim 0 : vector<32x128xf32>, i32 -> vector<32x128xf32>
    %c15_i32_31 = arith.constant 15 : i32
    %77 = vector.broadcast %c15_i32_31 : i32 to vector<32x1xi32>
    %78 = arith.cmpi slt, %5, %77 : vector<32x1xi32>
    %cst_32 = arith.constant 0.000000e+00 : f32
    %79 = vector.shape_cast %78 : vector<32x1xi1> to vector<32x1xi1>
    %80 = vector.broadcast %79 : vector<32x1xi1> to vector<32x128xi1>
    %81 = vector.broadcast %cst_32 : f32 to vector<32x128xf32>
    %82 = arith.select %80, %76, %81 : vector<32x128xi1>, vector<32x128xf32>
    %c30_i32_33 = arith.constant 30 : i32
    %83 = tpu.dynamic_rotate %61 by %c30_i32_33 dim 0 : vector<32x128xf32>, i32 -> vector<32x128xf32>
    %c14_i32_34 = arith.constant 14 : i32
    %84 = vector.broadcast %c14_i32_34 : i32 to vector<32x1xi32>
    %85 = arith.cmpi slt, %5, %84 : vector<32x1xi32>
    %cst_35 = arith.constant 0.000000e+00 : f32
    %86 = vector.shape_cast %85 : vector<32x1xi1> to vector<32x1xi1>
    %87 = vector.broadcast %86 : vector<32x1xi1> to vector<32x128xi1>
    %88 = vector.broadcast %cst_35 : f32 to vector<32x128xf32>
    %89 = arith.select %87, %83, %88 : vector<32x128xi1>, vector<32x128xf32>
    %90 = tpu.concatenate %68, %75, %61, %82, %89 in 1 : vector<32x128xf32>, vector<32x128xf32>, vector<32x128xf32>, vector<32x128xf32>, vector<32x128xf32> -> vector<32x640xf32>
    %c0_36 = arith.constant 0 : index
    %c0_37 = arith.constant 0 : index
    %91 = vector.load %arg5[%c0_36, %c0_37] : memref<640x128xf32, #tpu.memory_space<vmem>>, vector<640x128xf32>
    %cst_38 = arith.constant dense<0.000000e+00> : vector<32x128xf32>
    %92 = tpu.matmul %90, %91, %cst_38 {dimension_numbers = #tpu.dot_dimension_numbers<[1], [0], [0], [1], [0, 0, 1, 1], [], []>} : vector<32x640xf32>, vector<640x128xf32>, vector<32x128xf32> -> vector<32x128xf32>
    %c0_39 = arith.constant 0 : index
    %c0_40 = arith.constant 0 : index
    %93 = vector.load %arg6[%c0_39, %c0_40] : memref<1x128xf32, #tpu.memory_space<vmem>>, vector<1x128xf32>
    %94 = vector.broadcast %93 : vector<1x128xf32> to vector<32x128xf32>
    %95 = arith.addf %92, %94 : vector<32x128xf32>
    %cst_41 = arith.constant 0.000000e+00 : f32
    %96 = vector.broadcast %cst_41 : f32 to vector<32x128xf32>
    %97 = arith.maximumf %95, %96 : vector<32x128xf32>
    %98 = vector.broadcast %1 : vector<32x1xf32> to vector<32x128xf32>
    %99 = arith.mulf %97, %98 : vector<32x128xf32>
    %c0_42 = arith.constant 0 : index
    %c0_43 = arith.constant 0 : index
    %100 = vector.load %arg7[%c0_42, %c0_43] : memref<128x128xf32, #tpu.memory_space<vmem>>, vector<128x128xf32>
    %cst_44 = arith.constant dense<0.000000e+00> : vector<32x128xf32>
    %101 = tpu.matmul %99, %100, %cst_44 {dimension_numbers = #tpu.dot_dimension_numbers<[1], [0], [0], [1], [0, 0, 1, 1], [], []>} : vector<32x128xf32>, vector<128x128xf32>, vector<32x128xf32> -> vector<32x128xf32>
    %c0_45 = arith.constant 0 : index
    %c0_46 = arith.constant 0 : index
    %102 = vector.load %arg8[%c0_45, %c0_46] : memref<1x128xf32, #tpu.memory_space<vmem>>, vector<1x128xf32>
    %103 = vector.broadcast %102 : vector<1x128xf32> to vector<32x128xf32>
    %104 = arith.addf %101, %103 : vector<32x128xf32>
    %105 = vector.shape_cast %104 : vector<32x128xf32> to vector<2x16x128xf32>
    %c0_47 = arith.constant 0 : index
    %c0_48 = arith.constant 0 : index
    %c0_49 = arith.constant 0 : index
    %106 = vector.load %arg9[%c0_47, %c0_48, %c0_49] : memref<2x16x128xf32, #tpu.memory_space<vmem>>, vector<2x16x128xf32>
    tpu.vector_store %arg9[%c0_47, %c0_48, %c0_49], %105 {strides = array<i32>} : memref<2x16x128xf32, #tpu.memory_space<vmem>>, vector<2x16x128xf32>,
    return
  }
  func.func @transform_0(%arg0: i32) -> (i32, i32, i32) {
    %c0_i32 = arith.constant 0 : i32
    %c0_i32_0 = arith.constant 0 : i32
    %c0_i32_1 = arith.constant 0 : i32
    return %arg0, %c0_i32, %c0_i32_0 : i32, i32, i32
  }
  func.func @transform_1(%arg0: i32) -> (i32, i32, i32) {
    %c0_i32 = arith.constant 0 : i32
    %c0_i32_0 = arith.constant 0 : i32
    %c0_i32_1 = arith.constant 0 : i32
    return %arg0, %c0_i32, %c0_i32_0 : i32, i32, i32
  }
  func.func @transform_2(%arg0: i32) -> (i32, i32) {
    %c0_i32 = arith.constant 0 : i32
    %c0_i32_0 = arith.constant 0 : i32
    %c0_i32_1 = arith.constant 0 : i32
    return %c0_i32, %c0_i32_0 : i32, i32
  }
  func.func @transform_3(%arg0: i32) -> (i32, i32) {
    %c0_i32 = arith.constant 0 : i32
    %c0_i32_0 = arith.constant 0 : i32
    %c0_i32_1 = arith.constant 0 : i32
    return %c0_i32, %c0_i32_0 : i32, i32
  }
  func.func @transform_4(%arg0: i32) -> (i32, i32) {
    %c0_i32 = arith.constant 0 : i32
    %c0_i32_0 = arith.constant 0 : i32
    %c0_i32_1 = arith.constant 0 : i32
    return %c0_i32, %c0_i32_0 : i32, i32
  }
  func.func @transform_5(%arg0: i32) -> (i32, i32) {
    %c0_i32 = arith.constant 0 : i32
    %c0_i32_0 = arith.constant 0 : i32
    %c0_i32_1 = arith.constant 0 : i32
    return %c0_i32, %c0_i32_0 : i32, i32
  }
  func.func @transform_6(%arg0: i32) -> (i32, i32) {
    %c0_i32 = arith.constant 0 : i32
    %c0_i32_0 = arith.constant 0 : i32
    %c0_i32_1 = arith.constant 0 : i32
    return %c0_i32, %c0_i32_0 : i32, i32
  }
  func.func @transform_7(%arg0: i32) -> (i32, i32) {
    %c0_i32 = arith.constant 0 : i32
    %c0_i32_0 = arith.constant 0 : i32
    %c0_i32_1 = arith.constant 0 : i32
    return %c0_i32, %c0_i32_0 : i32, i32
  }
  func.func @transform_8(%arg0: i32) -> (i32, i32, i32) {
    %c0_i32 = arith.constant 0 : i32
    %c0_i32_0 = arith.constant 0 : i32
    %c0_i32_1 = arith.constant 0 : i32
    return %arg0, %c0_i32, %c0_i32_0 : i32, i32, i32
  }
}

</mosaic_0001>

<bundles_post_ra>
// kernel: tpu_custom_call.1
= control target key start
LH: loop header
LB: loop body
LE: loop exit
PB: predicated region body
PF: predicated region fallthrough
CT: control target
= control target key end

     0   :  { %13 = vsyncpa [#allocation3], 0  ;;  %s1246_s0 = inlined_call_operand.vmem [shape: s32[2,16,1], index: 0, kind: input, shape index: {}]   ;;  %s1247_s1 = inlined_call_operand.vmem [shape: f32[2,16,1], index: 1, kind: input, shape index: {}]   ;;  %s1248_s2 = inlined_call_operand.vmem [shape: f32[40,128], index: 2, kind: input, shape index: {}]   ;;  %s1249_s3 = inlined_call_operand.vmem [shape: f32[1,128], index: 3, kind: input, shape index: {}]   ;;  %s1250_s4 = inlined_call_operand.hbm [shape: f32[640,128], index: 4, kind: input, shape index: {}]   ;;  %s1251_s5 = inlined_call_operand.vmem [shape: f32[1,128], index: 5, kind: input, shape index: {}]   ;;  %s1252_s6 = inlined_call_operand.hbm [shape: f32[128,128], index: 6, kind: input, shape index: {}]   ;;  %s1253_s7 = inlined_call_operand.vmem [shape: f32[1,128], index: 7, kind: input, shape index: {}]   ;;  %s1254_s8 = inlined_call_operand.hbm [shape: f32[2,16,128], index: 8, kind: output, shape index: {}]  }
   0x1   :  { %14 = vsyncpa [#allocation6], 0 }
   0x2   :  { %15 = vsyncpa [#allocation4], 0  ;;  %s28_s29 = sshll.u32 %s1250_s4, 4  ;;  %s936_s30 = smov [#allocation2]   ;;  %s29_s29 = int_to_ptr.hbm [resolvable:$true] %s28_s29 }
   0x3   :  { %s30_s9 = sshll.u32 %s936_s30, 4  ;;  %s43_s12 = sshll.u32 %s1252_s6, 4  ;;  %s31_s9 = int_to_ptr.vmem [resolvable:$true] %s30_s9  ;;  %s44_s12 = int_to_ptr.hbm [resolvable:$true] %s43_s12 }
   0x4   :  { %s937_s13 = smov 128   ;;  %s938_s14 = smov 8  }
   0x5   :  { %36 = dma.hbm_to_vmem [thread:$0]  %s29_s29, 10240, %s31_s9, [#allocation3], %s937_s13, %s937_s13, %s938_s14  }
   0x6   :  { %s939_s15 = smov [#allocation5]  }
   0x7   :  { %s45_s16 = sshll.u32 %s939_s15, 4  ;;  %s46_s16 = int_to_ptr.vmem [resolvable:$true] %s45_s16 }
   0x8   :  { %51 = dma.hbm_to_vmem [thread:$0]  %s44_s12, 2048, %s46_s16, [#allocation6], %s937_s13, %s937_s13, %s938_s14  }
   0x9   :  { %930 = dma.done.wait [#allocation3], 10240  }
   0xa   :  { %931 = vsyncadd [#allocation3], 4294957056 }
   0xb   :  { %932 = dma.done.wait [#allocation6], 2048  }
   0xc   :  { %933 = vsyncadd [#allocation6], 4294965248  ;;  %v940_v0 = vmov 0   ;;  %v66_v1 = vld [vmem:[%s1246_s0] sm:$0xff]  ;;  %v68_v3 = vld [vmem:[%s1246_s0 + $0x10] sm:$0xff]  ;;  %v70_v13 = vlaneseq  ;;  %v941_v19 = vmov 0.0  }
   0xd   :  { %853 = vset.pattern.permute.xlu1 %v940_v0  ;;  %852 = vset.pattern.permute.xlu0 %v940_v0  ;;  %v62_v2 = vld [vmem:[%s1247_s1] sm:$0xff]  ;;  %v67_v4 = vld [vmem:[%s1246_s0 + $0x8] sm:$0xff]  ;;  %v64_v6 = vld [vmem:[%s1247_s1 + $0x10] sm:$0xff]  ;;  %vm201_vm1 = vcmask 64512   ;;  %s942_s20 = smov [#allocation7]   ;;  %s782_s24 = sshll.u32 %s1254_s8, 4  ;;  %s783_s24 = int_to_ptr.hbm [resolvable:$true] %s782_s24 }
   0xe   :  { %854 = vset.pattern.permute.xlu2 %v940_v0  ;;  %76 = vperm.xlu0 %852, %v66_v1   ;;  %v63_v5 = vld [vmem:[%s1247_s1 + $0x8] sm:$0xff]  ;;  %v69_v7 = vld [vmem:[%s1246_s0 + $0x18] sm:$0xff]  ;;  %v284_v9 = vld [vmem:[%s1248_s2 + $0x10] sm:$0xff]  ;;  %v74_v14 = vand.u32 127, %v70_v13  ;;  %v1046_v22 = vshrl.u32 %v70_v13, 7  ;;  %s780_s21 = sshll.u32 %s942_s20, 4  ;;  %s781_s21 = int_to_ptr.vmem [resolvable:$true] %s780_s21 }
   0xf   :  { %101 = vperm.xlu1 %853, %v62_v2   ;;  %82 = vperm.xlu2 %854, %v68_v3   ;;  %v65_v8 = vld [vmem:[%s1247_s1 + $0x18] sm:$0xff]  ;;  %v200_v10 = vld [vmem:[%s1248_s2 + $0x8] sm:$0xff]  ;;  %v199_v12 = vld [vmem:[%s1248_s2] sm:$0xff] }
  0x10   :  { %312 = vmatpush.msra.mxu2 %v284_v9  ;;  %v330_v11 = vld [vmem:[%s1248_s2 + $0x18] sm:$0xff]  ;;  %828 = vmatpush.msra.mxu3 %v200_v10  ;;  %v376_v16 = vld [vmem:[%s1248_s2 + $0x20] sm:$0xff]  ;;  %vm146_vm4 = vcmp.lt.s32.totalorder %v1046_v22, 1  ;;  %vm151_vm6 = vcmp.ge.s32.totalorder %v1046_v22, 1  ;;  %vm127_vm7 = vcmp.lt.s32.totalorder %v1046_v22, 2  ;;  %vm132_vm8 = vcmp.ge.s32.totalorder %v1046_v22, 2 }
  0x11   :  { %229 = vmatpush.msra.mxu0 %v200_v10  ;;  %270 = vmatpush.msra.mxu1 %v199_v12  ;;  %vm184_vm9 = vcmp.lt.s32.totalorder %v1046_v22, 6  ;;  %v1101_v54 = vadd.s32 8, %v1046_v22  ;;  %vm165_vm10 = vcmp.lt.s32.totalorder %v1046_v22, 7  ;;  %v532_v12 = vld [vmem:[#allocation2 + $0x170] sm:$0xff]  ;;  %v531_v13 = vld [vmem:[#allocation2 + $0x168] sm:$0xff]  ;;  %v730_v22 = vld [vmem:[#allocation5 + $0x38] sm:$0xff] }
  0x12   :  { %358 = vmatpush.msrb.mxu3 %v330_v11  ;;  %v533_v11 = vld [vmem:[#allocation2 + $0x178] sm:$0xff] }
  0x13   :  { %404 = vmatpush.msrb.mxu0 %v376_v16  ;;  %vm190_vm11 = vcmp.lt.s32.totalorder %v1101_v54, 14  ;;  %vm171_vm12 = vcmp.lt.s32.totalorder %v1101_v54, 15  ;;  %v528_v16 = vld [vmem:[#allocation2 + $0x150] sm:$0xff]  ;;  %v728_v54 = vld [vmem:[#allocation5 + $0x28] sm:$0xff] }
  0x16   :  { %79 = vperm.xlu0 %852, %v67_v4  }
  0x17   :  { %106 = vperm.xlu1 %853, %v63_v5   ;;  %111 = vperm.xlu2 %854, %v64_v6  }
  0x1e   :  { %85 = vperm.xlu0 %852, %v69_v7  }
  0x1f   :  { %116 = vperm.xlu1 %853, %v65_v8  }
  0x69   :  { %v83_v15 = vpop.permute.xlu2 %82 }
  0x6a   :  { %vm89_vm2 = vcmp.eq.s32.totalorder %v74_v14, %v83_v15  ;;  %v529_v15 = vld [vmem:[#allocation2 + $0x158] sm:$0xff] }
  0x6b   :  { %v798_v25 = vsel %vm89_vm2, 1.0, %v941_v19 }
  0x71   :  { %v1050_v26 = vpop.permute.xlu2 %111 }
  0x72   :  { %v1054_v29 = vmul.f32 %v798_v25, %v1050_v26  ;;  %v525_v25 = vld [vmem:[#allocation2 + $0x138] sm:$0xff] }
  0x74   :  { %v144_v34 = vrot.slane %v1054_v29, 7  ;;  %v125_v53 = vrot.slane %v1054_v29, 6  ;;  %v182_v55 = vrot.slane %v1054_v29, 2  ;;  %v163_v63 = vrot.slane %v1054_v29, 1 }
  0x80   :  { %v77_v17 = vpop.permute.xlu0 %76 }
  0x81   :  { %v1039_v18 = vpop.permute.xlu1 %101  ;;  %vm87_vm0 = vcmp.eq.s32.totalorder %v74_v14, %v77_v17  ;;  %v549_v17 = vld [vmem:[#allocation2 + $0x1f8] sm:$0xff] }
  0x82   :  { %v796_v20 = vsel %vm87_vm0, 1.0, %v941_v19 }
  0x83   :  { %v1042_v21 = vmul.f32 %v796_v20, %v1039_v18  ;;  %v548_v20 = vld [vmem:[#allocation2 + $0x1f0] sm:$0xff] }
  0x85   :  { %808 = vmatmul.msk.f32.vlgmr.msra.gmra.mxu2 %vm201_vm1, %v1042_v21  ;;  %v142_v30 = vrot.slane %v1042_v21, 7  ;;  %v123_v40 = vrot.slane %v1042_v21, 6  ;;  %v180_v49 = vrot.slane %v1042_v21, 2  ;;  %v161_v57 = vrot.slane %v1042_v21, 1  ;;  %v526_v21 = vld [vmem:[#allocation2 + $0x140] sm:$0xff] }
  0x88   :  { %v80_v23 = vpop.permute.xlu0 %79 }
  0x89   :  { %v1048_v24 = vpop.permute.xlu1 %106  ;;  %vm88_vm3 = vcmp.eq.s32.totalorder %v74_v14, %v80_v23  ;;  %v547_v23 = vld [vmem:[#allocation2 + $0x1e8] sm:$0xff] }
  0x8a   :  { %v797_v27 = vsel %vm88_vm3, 1.0, %v941_v19 }
  0x8b   :  { %v120_v28 = vmul.f32 %v797_v27, %v1048_v24  ;;  %v546_v27 = vld [vmem:[#allocation2 + $0x1e0] sm:$0xff] }
  0x8d   :  { %809 = vmatmul.msk.f32.gmra.mxu2 %vm201_vm1, %v120_v28  ;;  %v143_v31 = vrot.slane %v120_v28, 7  ;;  %v124_v47 = vrot.slane %v120_v28, 6  ;;  %v181_v48 = vrot.slane %v120_v28, 2  ;;  %v162_v56 = vrot.slane %v120_v28, 1  ;;  %v524_v28 = vld [vmem:[#allocation2 + $0x130] sm:$0xff] }
  0x8f   :  { %v149_v32 = vsel %vm146_vm4, %v142_v30, %v143_v31  ;;  %v148_v38 = vsel %vm146_vm4, %v143_v31, %v144_v34  ;;  %v130_v51 = vsel %vm127_vm7, %v123_v40, %v124_v47  ;;  %v187_v52 = vsel %vm184_vm9, %v180_v49, %v181_v48  ;;  %v544_v31 = vld [vmem:[#allocation2 + $0x1d0] sm:$0xff] }
  0x90   :  { %v86_v33 = vpop.permute.xlu0 %85  ;;  %801 = vmatmul.msk.f32.vlgmr.msra.gmra.mxu3 %vm201_vm1, %v149_v32  ;;  %v159_v42 = vsel %vm151_vm6, %v148_v38, 0.0  ;;  %v129_v58 = vsel %vm127_vm7, %v124_v47, %v125_v53  ;;  %v186_v59 = vsel %vm184_vm9, %v181_v48, %v182_v55  ;;  %v168_v60 = vsel %vm165_vm10, %v161_v57, %v162_v56  ;;  %v522_v32 = vld [vmem:[#allocation2 + $0x120] sm:$0xff]  ;;  %v499_v47 = vld [vmem:[#allocation2 + $0x68] sm:$0xff] }
  0x91   :  { %vm90_vm5 = vcmp.eq.s32.totalorder %v74_v14, %v86_v33  ;;  %v1063_v36 = vpop.permute.xlu1 %116  ;;  %v140_v61 = vsel %vm132_vm8, %v129_v58, 0.0  ;;  %v196_v62 = vsel %vm190_vm11, %v186_v59, 0.0  ;;  %v167_v0 = vsel %vm165_vm10, %v162_v56, %v163_v63  ;;  %628 = vmatpush.msra.mxu3 %v533_v11  ;;  %v530_v14 = vld [vmem:[#allocation2 + $0x160] sm:$0xff]  ;;  %v543_v33 = vld [vmem:[#allocation2 + $0x1c8] sm:$0xff]  ;;  %v513_v56 = vld [vmem:[#allocation2 + $0xd8] sm:$0xff] }
  0x92   :  { %v799_v35 = vsel %vm90_vm5, 1.0, %v941_v19  ;;  %v177_v2 = vsel %vm171_vm12, %v167_v0, 0.0  ;;  %v527_v19 = vld [vmem:[#allocation2 + $0x148] sm:$0xff]  ;;  %v508_v11 = vld [vmem:[#allocation2 + $0xb0] sm:$0xff] }
  0x93   :  { %v122_v37 = vmul.f32 %v799_v35, %v1063_v36  ;;  %629 = vmatpush.msra.mxu3 %v532_v12  ;;  %v542_v35 = vld [vmem:[#allocation2 + $0x1c0] sm:$0xff]  ;;  %v515_v48 = vld [vmem:[#allocation2 + $0xe8] sm:$0xff]  ;;  %v564_v12 = vld [vmem:[#allocation2 + $0x270] sm:$0xff] }
  0x94   :  { %v511_v0 = vld [vmem:[#allocation2 + $0xc8] sm:$0xff] }
  0x95   :  { %810 = vmatmul.msk.f32.gmra.mxu2 %vm201_vm1, %v1054_v29  ;;  %v145_v39 = vrot.slane %v122_v37, 7  ;;  %v126_v41 = vrot.slane %v122_v37, 6  ;;  %v183_v1 = vrot.slane %v122_v37, 2  ;;  %v164_v5 = vrot.slane %v122_v37, 1  ;;  %630 = vmatpush.msra.mxu3 %v531_v13  ;;  %v545_v29 = vld [vmem:[#allocation2 + $0x1d8] sm:$0xff] }
  0x97   :  { %v150_v43 = vsel %vm146_vm4, %v145_v39, %v142_v30  ;;  %v131_v44 = vsel %vm127_vm7, %v126_v41, %v123_v40  ;;  %v147_v50 = vsel %vm146_vm4, %v144_v34, %v145_v39  ;;  %v128_v3 = vsel %vm127_vm7, %v125_v53, %v126_v41  ;;  %631 = vmatpush.msra.mxu3 %v530_v14  ;;  %v523_v30 = vld [vmem:[#allocation2 + $0x128] sm:$0xff]  ;;  %v521_v34 = vld [vmem:[#allocation2 + $0x118] sm:$0xff] }
  0x98   :  { %802 = vmatmul.msk.f32.gmra.mxu3 %vm201_vm1, %v159_v42  ;;  %v157_v45 = vsel %vm151_vm6, %v150_v43, 0.0  ;;  %v138_v46 = vsel %vm132_vm8, %v131_v44, 0.0  ;;  %v185_v4 = vsel %vm184_vm9, %v182_v55, %v183_v1  ;;  %v188_v6 = vsel %vm184_vm9, %v183_v1, %v180_v49  ;;  %v501_v39 = vld [vmem:[#allocation2 + $0x78] sm:$0xff]  ;;  %v519_v42 = vld [vmem:[#allocation2 + $0x108] sm:$0xff]  ;;  %v500_v43 = vld [vmem:[#allocation2 + $0x70] sm:$0xff] }
  0x99   :  { %800 = vmatmul.msk.f32.vlgmr.msra.gmra.mxu0 %vm201_vm1, %v157_v45  ;;  %804 = vmatmul.msk.f32.vlgmr.msra.gmra.mxu1 %vm201_vm1, %v138_v46  ;;  %v166_v7 = vsel %vm165_vm10, %v163_v63, %v164_v5  ;;  %v198_v8 = vsel %vm190_vm11, %v188_v6, 0.0  ;;  %v169_v9 = vsel %vm165_vm10, %v164_v5, %v161_v57  ;;  %v517_v40 = vld [vmem:[#allocation2 + $0xf8] sm:$0xff]  ;;  %v516_v44 = vld [vmem:[#allocation2 + $0xf0] sm:$0xff]  ;;  %v518_v46 = vld [vmem:[#allocation2 + $0x100] sm:$0xff] }
  0x9a   :  { %v179_v10 = vsel %vm171_vm12, %v169_v9, 0.0  ;;  %632 = vmatpush.msra.mxu3 %v529_v15  ;;  %657 = vmatpush.msra.mxu0 %v549_v17  ;;  %v541_v41 = vld [vmem:[#allocation2 + $0x1b8] sm:$0xff]  ;;  %v540_v45 = vld [vmem:[#allocation2 + $0x1b0] sm:$0xff]  ;;  %v539_v49 = vld [vmem:[#allocation2 + $0x1a8] sm:$0xff] }
  0x9b   :  { %570 = vmatpush.msrb.mxu1 %v501_v39  ;;  %599 = vmatpush.msrb.mxu2 %v517_v40  ;;  %v497_v55 = vld [vmem:[#allocation2 + $0x58] sm:$0xff]  ;;  %v495_v63 = vld [vmem:[#allocation2 + $0x48] sm:$0xff] }
  0x9c   :  { %633 = vmatpush.msra.mxu3 %v528_v16  ;;  %658 = vmatpush.msra.mxu0 %v548_v20  ;;  %v537_v57 = vld [vmem:[#allocation2 + $0x198] sm:$0xff]  ;;  %v535_v1 = vld [vmem:[#allocation2 + $0x188] sm:$0xff]  ;;  %v490_v20 = vld [vmem:[#allocation2 + $0x20] sm:$0xff] }
  0x9d   :  { %811 = vmatmul.msk.f32.gmra.mxu2 %vm201_vm1, %v122_v37  ;;  %v520_v37 = vld [vmem:[#allocation2 + $0x110] sm:$0xff]  ;;  %571 = vmatpush.msrb.mxu1 %v500_v43  ;;  %v565_v9 = vld [vmem:[#allocation2 + $0x278] sm:$0xff]  ;;  %v491_v16 = vld [vmem:[#allocation2 + $0x28] sm:$0xff] }
  0x9e   :  { %634 = vmatpush.msra.mxu3 %v527_v19  ;;  %659 = vmatpush.msra.mxu0 %v547_v23  ;;  %v507_v17 = vld [vmem:[#allocation2 + $0xa8] sm:$0xff]  ;;  %v562_v23 = vld [vmem:[#allocation2 + $0x260] sm:$0xff] }
  0x9f   :  { %600 = vmatpush.msrb.mxu2 %v516_v44  ;;  %572 = vmatpush.msrb.mxu1 %v499_v47  ;;  %v563_v19 = vld [vmem:[#allocation2 + $0x268] sm:$0xff]  ;;  %v486_v44 = vld [vmem:[#allocation2] sm:$0xff] }
  0xa0   :  { %803 = vmatmul.msk.f32.gmra.mxu3 %vm201_vm1, %v147_v50  ;;  %660 = vmatpush.msra.mxu0 %v546_v27  ;;  %v498_v50 = vld [vmem:[#allocation2 + $0x60] sm:$0xff]  ;;  %v487_v39 = vld [vmem:[#allocation2 + $0x8] sm:$0xff] }
  0xa1   :  { %805 = vmatmul.msk.f32.gmra.mxu1 %vm201_vm1, %v130_v51  ;;  %816 = vmatmul.msk.f32.vlgmr.msrb.gmra.mxu0 %vm201_vm1, %v187_v52  ;;  %v514_v51 = vld [vmem:[#allocation2 + $0xe0] sm:$0xff]  ;;  %v503_v40 = vld [vmem:[#allocation2 + $0x88] sm:$0xff] }
  0xa2   :  { %635 = vmatpush.msra.mxu3 %v526_v21  ;;  %661 = vmatpush.msra.mxu0 %v545_v29  ;;  %v538_v52 = vld [vmem:[#allocation2 + $0x1a0] sm:$0xff]  ;;  %v489_v29 = vld [vmem:[#allocation2 + $0x18] sm:$0xff]  ;;  %v559_v43 = vld [vmem:[#allocation2 + $0x248] sm:$0xff] }
  0xa3   :  { %601 = vmatpush.msrb.mxu2 %v515_v48  ;;  %573 = vmatpush.msrb.mxu1 %v498_v50  ;;  %v506_v21 = vld [vmem:[#allocation2 + $0xa0] sm:$0xff] }
  0xa4   :  { %636 = vmatpush.msra.mxu3 %v525_v25  ;;  %662 = vmatpush.msra.mxu0 %v544_v31  ;;  %v1155_v27 = vld [vmem:[%s1249_s3] ss:$0 sm:$0xff]  ;;  %v561_v31 = vld [vmem:[#allocation2 + $0x258] sm:$0xff] }
  0xa5   :  { %602 = vmatpush.msrb.mxu2 %v514_v51  ;;  %574 = vmatpush.msrb.mxu1 %v497_v55  ;;  %v558_v48 = vld [vmem:[#allocation2 + $0x240] sm:$0xff] }
  0xa6   :  { %637 = vmatpush.msra.mxu3 %v524_v28  ;;  %663 = vmatpush.msra.mxu0 %v543_v33  ;;  %v488_v33 = vld [vmem:[#allocation2 + $0x10] sm:$0xff] }
  0xa7   :  { %603 = vmatpush.msrb.mxu2 %v513_v56 }
  0xa8   :  { %812 = vmatmul.msk.f32.vlgmr.msrb.gmra.mxu3 %vm201_vm1, %v168_v60  ;;  %664 = vmatpush.msra.mxu0 %v542_v35  ;;  %v496_v60 = vld [vmem:[#allocation2 + $0x50] sm:$0xff] }
  0xa9   :  { %806 = vmatmul.msk.f32.gmra.mxu1 %vm201_vm1, %v140_v61  ;;  %817 = vmatmul.msk.f32.gmra.mxu0 %vm201_vm1, %v196_v62  ;;  %v512_v61 = vld [vmem:[#allocation2 + $0xd0] sm:$0xff] }
  0xaa   :  { %638 = vmatpush.msra.mxu3 %v523_v30  ;;  %665 = vmatpush.msra.mxu0 %v541_v41  ;;  %v536_v62 = vld [vmem:[#allocation2 + $0x190] sm:$0xff]  ;;  %v505_v30 = vld [vmem:[#allocation2 + $0x98] sm:$0xff] }
  0xab   :  { %575 = vmatpush.msrb.mxu1 %v496_v60  ;;  %604 = vmatpush.msrb.mxu2 %v512_v61  ;;  %v560_v35 = vld [vmem:[#allocation2 + $0x250] sm:$0xff]  ;;  %v555_v60 = vld [vmem:[#allocation2 + $0x228] sm:$0xff] }
  0xac   :  { %639 = vmatpush.msra.mxu3 %v522_v32  ;;  %666 = vmatpush.msra.mxu0 %v540_v45  ;;  %v502_v45 = vld [vmem:[#allocation2 + $0x80] sm:$0xff] }
  0xad   :  { %576 = vmatpush.msrb.mxu1 %v495_v63  ;;  %605 = vmatpush.msrb.mxu2 %v511_v0  ;;  %v554_v63 = vld [vmem:[#allocation2 + $0x220] sm:$0xff] }
  0xae   :  { %640 = vmatpush.msra.mxu3 %v521_v34  ;;  %667 = vmatpush.msra.mxu0 %v539_v49  ;;  %v504_v34 = vld [vmem:[#allocation2 + $0x90] sm:$0xff] }
  0xb0   :  { %813 = vmatmul.msk.f32.gmra.mxu3 %vm201_vm1, %v177_v2  ;;  %668 = vmatpush.msra.mxu0 %v538_v52  ;;  %v494_v2 = vld [vmem:[#allocation2 + $0x40] sm:$0xff] }
  0xb1   :  { %807 = vmatmul.msk.f32.gmra.mxu1 %vm201_vm1, %v128_v3  ;;  %818 = vmatmul.msk.f32.gmra.mxu0 %vm201_vm1, %v185_v4  ;;  %v510_v3 = vld [vmem:[#allocation2 + $0xc0] sm:$0xff] }
  0xb2   :  { %641 = vmatpush.msra.mxu3 %v520_v37  ;;  %669 = vmatpush.msra.mxu0 %v537_v57  ;;  %v534_v4 = vld [vmem:[#allocation2 + $0x180] sm:$0xff]  ;;  %v556_v57 = vld [vmem:[#allocation2 + $0x230] sm:$0xff] }
  0xb3   :  { %577 = vmatpush.msrb.mxu1 %v494_v2  ;;  %606 = vmatpush.msrb.mxu2 %v510_v3  ;;  %v553_v3 = vld [vmem:[#allocation2 + $0x218] sm:$0xff] }
  0xb4   :  { %642 = vmatpush.msra.mxu3 %v519_v42  ;;  %670 = vmatpush.msra.mxu0 %v536_v62 }
  0xb6   :  { %643 = vmatpush.msra.mxu3 %v518_v46  ;;  %671 = vmatpush.msra.mxu0 %v535_v1 }
  0xb8   :  { %814 = vmatmul.msk.f32.gmra.mxu3 %vm201_vm1, %v166_v7  ;;  %672 = vmatpush.msra.mxu0 %v534_v4  ;;  %v493_v7 = vld [vmem:[#allocation2 + $0x38] sm:$0xff] }
  0xb9   :  { %819 = vmatmul.msk.f32.gmra.mxu0 %vm201_vm1, %v198_v8  ;;  %v509_v8 = vld [vmem:[#allocation2 + $0xb8] sm:$0xff]  ;;  %578 = vmatpush.msrb.mxu1 %v493_v7 }
  0xba   :  { %607 = vmatpush.msrb.mxu2 %v509_v8  ;;  %686 = vmatpush.msrb.mxu0 %v565_v9  ;;  %v552_v8 = vld [vmem:[#allocation2 + $0x210] sm:$0xff] }
  0xbc   :  { %608 = vmatpush.msrb.mxu2 %v508_v11  ;;  %687 = vmatpush.msrb.mxu0 %v564_v12 }
  0xbe   :  { %609 = vmatpush.msrb.mxu2 %v507_v17  ;;  %688 = vmatpush.msrb.mxu0 %v563_v19  ;;  %v550_v17 = vld [vmem:[#allocation2 + $0x200] sm:$0xff] }
  0xc0   :  { %815 = vmatmul.msk.f32.gmra.mxu3 %vm201_vm1, %v179_v10  ;;  %v492_v10 = vld [vmem:[#allocation2 + $0x30] sm:$0xff]  ;;  %610 = vmatpush.msrb.mxu2 %v506_v21 }
  0xc1   :  { %579 = vmatpush.msrb.mxu1 %v492_v10  ;;  %689 = vmatpush.msrb.mxu0 %v562_v23 }
  0xc2   :  { %611 = vmatpush.msrb.mxu2 %v505_v30 }
  0xc3   :  { %580 = vmatpush.msrb.mxu1 %v491_v16  ;;  %690 = vmatpush.msrb.mxu0 %v561_v31 }
  0xc4   :  { %612 = vmatpush.msrb.mxu2 %v504_v34 }
  0xc5   :  { %581 = vmatpush.msrb.mxu1 %v490_v20  ;;  %691 = vmatpush.msrb.mxu0 %v560_v35 }
  0xc6   :  { %613 = vmatpush.msrb.mxu2 %v503_v40 }
  0xc7   :  { %582 = vmatpush.msrb.mxu1 %v489_v29  ;;  %692 = vmatpush.msrb.mxu0 %v559_v43 }
  0xc8   :  { %614 = vmatpush.msrb.mxu2 %v502_v45 }
  0xc9   :  { %583 = vmatpush.msrb.mxu1 %v488_v33  ;;  %693 = vmatpush.msrb.mxu0 %v558_v48 }
  0xcb   :  { %584 = vmatpush.msrb.mxu1 %v487_v39 }
  0xcd   :  { %585 = vmatpush.msrb.mxu1 %v486_v44 }
  0xcf   :  { %829 = vmatpush.msra.mxu1 %v565_v9 }
  0xd1   :  { %830 = vmatpush.msra.mxu1 %v564_v12 }
  0xd3   :  { %831 = vmatpush.msra.mxu1 %v563_v19 }
  0xd5   :  { %832 = vmatpush.msra.mxu1 %v562_v23 }
  0xd7   :  { %833 = vmatpush.msra.mxu1 %v561_v31 }
  0xd9   :  { %834 = vmatpush.msra.mxu1 %v560_v35 }
  0xdb   :  { %835 = vmatpush.msra.mxu1 %v559_v43 }
  0xdd   :  { %836 = vmatpush.msra.mxu1 %v558_v48 }
 0x108   :  { %v314_v5 = vpop.f32.mrf.mxu2 }
 0x110   :  { %v317_v37 = vpop.f32.mrf.mxu2 }
 0x113   :  { %v1146_v38 = vpop.f32.mrf.mxu3 }
 0x116   :  { %v272_v58 = vpop.f32.mrf.mxu1  ;;  %v231_v59 = vpop.f32.mrf.mxu0 }
 0x117   :  { %v273_v13 = vadd.f32 %v272_v58, %v231_v59 }
 0x118   :  { %v320_v61 = vpop.f32.mrf.mxu2 }
 0x119   :  { %v326_v25 = vadd.f32 %v314_v5, %v273_v13  ;;  %v551_v13 = vld [vmem:[#allocation2 + $0x208] sm:$0xff] }
 0x11b   :  { %v1148_v53 = vpop.f32.mrf.mxu3 }
 0x11e   :  { %v275_v14 = vpop.f32.mrf.mxu1  ;;  %v406_v15 = vpop.f32.mrf.mxu0 }
 0x11f   :  { %v276_v41 = vadd.f32 %v275_v14, %v1146_v38  ;;  %v557_v38 = vld [vmem:[#allocation2 + $0x238] sm:$0xff] }
 0x120   :  { %694 = vmatpush.msrb.mxu0 %v557_v38  ;;  %v323_v16 = vpop.f32.mrf.mxu2  ;;  %837 = vmatpush.msra.mxu1 %v557_v38 }
 0x121   :  { %v327_v51 = vadd.f32 %v317_v37, %v276_v41 }
 0x122   :  { %695 = vmatpush.msrb.mxu0 %v556_v57  ;;  %838 = vmatpush.msra.mxu1 %v556_v57 }
 0x123   :  { %v1150_v6 = vpop.f32.mrf.mxu3 }
 0x124   :  { %696 = vmatpush.msrb.mxu0 %v555_v60  ;;  %839 = vmatpush.msra.mxu1 %v555_v60 }
 0x126   :  { %v278_v46 = vpop.f32.mrf.mxu1  ;;  %v409_v49 = vpop.f32.mrf.mxu0  ;;  %697 = vmatpush.msrb.mxu0 %v554_v63  ;;  %840 = vmatpush.msra.mxu1 %v554_v63  ;;  %v738_v63 = vld [vmem:[#allocation5 + $0x78] sm:$0xff] }
 0x127   :  { %v279_v58 = vadd.f32 %v278_v46, %v1148_v53  ;;  %743 = vmatpush.msra.mxu2 %v738_v63 }
 0x128   :  { %698 = vmatpush.msrb.mxu0 %v553_v3  ;;  %841 = vmatpush.msra.mxu1 %v553_v3  ;;  %v734_v3 = vld [vmem:[#allocation5 + $0x58] sm:$0xff] }
 0x129   :  { %v328_v2 = vadd.f32 %v320_v61, %v279_v58 }
 0x12a   :  { %699 = vmatpush.msrb.mxu0 %v552_v8  ;;  %842 = vmatpush.msra.mxu1 %v552_v8  ;;  %v727_v8 = vld [vmem:[#allocation5 + $0x20] sm:$0xff] }
 0x12b   :  { %v360_v28 = vpop.f32.mrf.mxu3 }
 0x12c   :  { %v372_v32 = vadd.f32 %v360_v28, %v326_v25  ;;  %700 = vmatpush.msrb.mxu0 %v551_v13  ;;  %843 = vmatpush.msra.mxu1 %v551_v13  ;;  %v723_v13 = vld [vmem:[#allocation5] sm:$0xff] }
 0x12e   :  { %v418_v42 = vadd.f32 %v406_v15, %v372_v32  ;;  %v281_v0 = vpop.f32.mrf.mxu1  ;;  %v412_v4 = vpop.f32.mrf.mxu0  ;;  %701 = vmatpush.msrb.mxu0 %v550_v17  ;;  %844 = vmatpush.msra.mxu1 %v550_v17  ;;  %v856_v17 = vld [vmem:[%s1251_s5] ss:$0 sm:$0xff] }
 0x12f   :  { %v282_v9 = vadd.f32 %v281_v0, %v1150_v6  ;;  %v737_v0 = vld [vmem:[#allocation5 + $0x70] sm:$0xff] }
 0x130   :  { %v426_v47 = vadd.f32 %v1155_v27, %v418_v42  ;;  %744 = vmatpush.msra.mxu2 %v737_v0 }
 0x131   :  { %v329_v19 = vadd.f32 %v323_v16, %v282_v9 }
 0x132   :  { %v430_v50 = vmax.f32 %v426_v47, 0.0 }
 0x133   :  { %v363_v52 = vpop.f32.mrf.mxu3 }
 0x134   :  { %v1160_v55 = vmul.f32 %v430_v50, %v1039_v18  ;;  %v373_v56 = vadd.f32 %v363_v52, %v327_v51 }
 0x136   :  { %v419_v59 = vadd.f32 %v409_v49, %v373_v56  ;;  %644 = vmatmul.f32.vlgmr.msra.gmra.mxu3 %v1160_v55  ;;  %v462_v11 = vrot.slane %v1160_v55, 1  ;;  %v415_v25 = vpop.f32.mrf.mxu0  ;;  %v438_v34 = vrot.slane %v1160_v55, 6  ;;  %v450_v37 = vrot.slane %v1160_v55, 7 }
 0x137   :  { %v474_v51 = vrot.slane %v1160_v55, 2 }
 0x138   :  { %v427_v62 = vadd.f32 %v1155_v27, %v419_v59 }
 0x13a   :  { %v431_v1 = vmax.f32 %v427_v62, 0.0 }
 0x13b   :  { %v366_v5 = vpop.f32.mrf.mxu3 }
 0x13c   :  { %v1166_v53 = vmul.f32 %v431_v1, %v1048_v24  ;;  %v374_v7 = vadd.f32 %v366_v5, %v328_v2  ;;  %v736_v1 = vld [vmem:[#allocation5 + $0x68] sm:$0xff]  ;;  %v735_v2 = vld [vmem:[#allocation5 + $0x60] sm:$0xff] }
 0x13d   :  { %745 = vmatpush.msra.mxu2 %v736_v1  ;;  %v732_v5 = vld [vmem:[#allocation5 + $0x48] sm:$0xff] }
 0x13e   :  { %v420_v10 = vadd.f32 %v412_v4, %v374_v7  ;;  %647 = vmatmul.f32.gmra.mxu3 %v1166_v53  ;;  %v463_v12 = vrot.slane %v1166_v53, 1  ;;  %v439_v43 = vrot.slane %v1166_v53, 6  ;;  %v451_v44 = vrot.slane %v1166_v53, 7  ;;  %v733_v4 = vld [vmem:[#allocation5 + $0x50] sm:$0xff] }
 0x13f   :  { %v475_v50 = vrot.slane %v1166_v53, 2  ;;  %746 = vmatpush.msra.mxu2 %v735_v2  ;;  %v731_v53 = vld [vmem:[#allocation5 + $0x40] sm:$0xff]  ;;  %v729_v7 = vld [vmem:[#allocation5 + $0x30] sm:$0xff] }
 0x140   :  { %v428_v14 = vadd.f32 %v1155_v27, %v420_v10  ;;  %v468_v15 = vsel %vm165_vm10, %v462_v11, %v463_v12  ;;  %v444_v45 = vsel %vm127_vm7, %v438_v34, %v439_v43  ;;  %v456_v46 = vsel %vm146_vm4, %v450_v37, %v451_v44  ;;  %v726_v10 = vld [vmem:[#allocation5 + $0x18] sm:$0xff] }
 0x141   :  { %673 = vmatmul.f32.vlgmr.msra.gmra.mxu0 %v468_v15  ;;  %v480_v56 = vsel %vm184_vm9, %v474_v51, %v475_v50  ;;  %747 = vmatpush.msra.mxu2 %v734_v3 }
 0x142   :  { %v432_v6 = vmax.f32 %v428_v14, 0.0 }
 0x143   :  { %v369_v20 = vpop.f32.mrf.mxu3  ;;  %748 = vmatpush.msra.mxu2 %v733_v4 }
 0x144   :  { %v436_v21 = vmul.f32 %v432_v6, %v1050_v26  ;;  %v375_v23 = vadd.f32 %v369_v20, %v329_v19 }
 0x145   :  { %749 = vmatpush.msra.mxu2 %v732_v5 }
 0x146   :  { %v421_v28 = vadd.f32 %v415_v25, %v375_v23  ;;  %650 = vmatmul.f32.gmra.mxu3 %v436_v21  ;;  %v464_v29 = vrot.slane %v436_v21, 1  ;;  %v440_v48 = vrot.slane %v436_v21, 6  ;;  %v452_v49 = vrot.slane %v436_v21, 7 }
 0x147   :  { %v476_v58 = vrot.slane %v436_v21, 2  ;;  %750 = vmatpush.msra.mxu2 %v731_v53 }
 0x148   :  { %v429_v30 = vadd.f32 %v1155_v27, %v421_v28  ;;  %v467_v31 = vsel %vm165_vm10, %v463_v12, %v464_v29  ;;  %v443_v38 = vsel %vm127_vm7, %v439_v43, %v440_v48  ;;  %v455_v52 = vsel %vm146_vm4, %v451_v44, %v452_v49  ;;  %v724_v12 = vld [vmem:[#allocation5 + $0x8] sm:$0xff] }
 0x149   :  { %824 = vmatmul.msk.f32.gmra.mxu0 %vm171_vm12, %v467_v31  ;;  %v479_v59 = vsel %vm184_vm9, %v475_v50, %v476_v58  ;;  %751 = vmatpush.msra.mxu2 %v730_v22 }
 0x14a   :  { %v433_v32 = vmax.f32 %v429_v30, 0.0 }
 0x14b   :  { %752 = vmatpush.msra.mxu2 %v729_v7 }
 0x14c   :  { %v437_v33 = vmul.f32 %v433_v32, %v1063_v36 }
 0x14d   :  { %753 = vmatpush.msra.mxu2 %v728_v54 }
 0x14e   :  { %653 = vmatmul.f32.gmra.mxu3 %v437_v33  ;;  %v441_v35 = vrot.slane %v437_v33, 6  ;;  %v453_v39 = vrot.slane %v437_v33, 7  ;;  %v465_v27 = vrot.slane %v437_v33, 1  ;;  %v477_v60 = vrot.slane %v437_v33, 2 }
 0x14f   :  { %754 = vmatpush.msra.mxu2 %v727_v8 }
 0x150   :  { %v445_v40 = vsel %vm127_vm7, %v441_v35, %v438_v34  ;;  %v457_v41 = vsel %vm146_vm4, %v453_v39, %v450_v37  ;;  %v466_v42 = vsel %vm165_vm10, %v464_v29, %v465_v27  ;;  %v469_v47 = vsel %vm165_vm10, %v465_v27, %v462_v11  ;;  %v725_v11 = vld [vmem:[#allocation5 + $0x10] sm:$0xff] }
 0x151   :  { %820 = vmatmul.msk.f32.vlgmr.msrb.gmra.mxu1 %vm132_vm8, %v445_v40  ;;  %822 = vmatmul.msk.f32.vlgmr.msrb.gmra.mxu2 %vm151_vm6, %v457_v41  ;;  %v442_v57 = vsel %vm127_vm7, %v440_v48, %v441_v35  ;;  %v454_v55 = vsel %vm146_vm4, %v452_v49, %v453_v39  ;;  %v478_v61 = vsel %vm184_vm9, %v476_v58, %v477_v60 }
 0x152   :  { %679 = vmatmul.f32.gmra.mxu0 %v466_v42  ;;  %v481_v62 = vsel %vm184_vm9, %v477_v60, %v474_v51  ;;  %755 = vmatpush.msra.mxu2 %v726_v10 }
 0x154   :  { %756 = vmatpush.msra.mxu2 %v725_v11 }
 0x156   :  { %757 = vmatpush.msra.mxu2 %v724_v12 }
 0x158   :  { %758 = vmatpush.msra.mxu2 %v723_v13 }
 0x159   :  { %589 = vmatmul.f32.gmra.mxu1 %v444_v45  ;;  %618 = vmatmul.f32.gmra.mxu2 %v456_v46 }
 0x15a   :  { %825 = vmatmul.msk.f32.gmra.mxu0 %vm171_vm12, %v469_v47 }
 0x161   :  { %821 = vmatmul.msk.f32.gmra.mxu1 %vm132_vm8, %v443_v38  ;;  %823 = vmatmul.msk.f32.gmra.mxu2 %vm151_vm6, %v455_v52 }
 0x162   :  { %702 = vmatmul.f32.vlgmr.msrb.gmra.mxu0 %v480_v56 }
 0x169   :  { %595 = vmatmul.f32.gmra.mxu1 %v442_v57  ;;  %624 = vmatmul.f32.gmra.mxu2 %v454_v55 }
 0x171   :  { %826 = vmatmul.msk.f32.vlgmr.msra.gmra.mxu1 %vm190_vm11, %v479_v59 }
 0x179   :  { %708 = vmatmul.f32.gmra.mxu1 %v478_v61 }
 0x181   :  { %827 = vmatmul.msk.f32.gmra.mxu1 %vm190_vm11, %v481_v62 }
 0x1b9   :  { %v645_v25 = vpop.f32.mrf.mxu3 }
 0x1be   :  { %v674_v9 = vpop.f32.mrf.mxu0 }
 0x1c1   :  { %v648_v37 = vpop.f32.mrf.mxu3 }
 0x1c6   :  { %v677_v14 = vpop.f32.mrf.mxu0 }
 0x1c9   :  { %v651_v46 = vpop.f32.mrf.mxu3 }
 0x1ce   :  { %v587_v15 = vpop.f32.mrf.mxu1 }
 0x1cf   :  { %v680_v16 = vpop.f32.mrf.mxu0  ;;  %v588_v6 = vadd.f32 %v856_v17, %v587_v15 }
 0x1d1   :  { %v654_v58 = vpop.f32.mrf.mxu3 }
 0x1d4   :  { %v616_v19 = vpop.f32.mrf.mxu2 }
 0x1d5   :  { %v617_v20 = vadd.f32 %v616_v19, %v588_v6 }
 0x1d6   :  { %v590_v21 = vpop.f32.mrf.mxu1 }
 0x1d7   :  { %v683_v23 = vpop.f32.mrf.mxu0  ;;  %v646_v28 = vadd.f32 %v645_v25, %v617_v20  ;;  %v591_v35 = vadd.f32 %v856_v17, %v590_v21 }
 0x1d9   :  { %v675_v31 = vadd.f32 %v674_v9, %v646_v28 }
 0x1dc   :  { %v619_v29 = vpop.f32.mrf.mxu2 }
 0x1dd   :  { %v620_v27 = vadd.f32 %v619_v29, %v591_v35 }
 0x1de   :  { %v593_v30 = vpop.f32.mrf.mxu1 }
 0x1df   :  { %v703_v32 = vpop.f32.mrf.mxu0  ;;  %v649_v42 = vadd.f32 %v648_v37, %v620_v27  ;;  %v594_v43 = vadd.f32 %v856_v17, %v593_v30 }
 0x1e0   :  { %v704_v33 = vadd.f32 %v703_v32, %v675_v31 }
 0x1e1   :  { %v678_v45 = vadd.f32 %v677_v14, %v649_v42 }
 0x1e2   :  { %v715_v34 = vmax.f32 %v704_v33, 0.0 }
 0x1e4   :  { %v719_v39 = vmul.f32 %v715_v34, %v1039_v18  ;;  %v622_v41 = vpop.f32.mrf.mxu2 }
 0x1e5   :  { %v623_v44 = vadd.f32 %v622_v41, %v594_v43 }
 0x1e6   :  { %759 = vmatmul.f32.vlgmr.msra.gmra.mxu2 %v719_v39  ;;  %v596_v40 = vpop.f32.mrf.mxu1 }
 0x1e7   :  { %v652_v49 = vadd.f32 %v651_v46, %v623_v44  ;;  %v597_v38 = vadd.f32 %v856_v17, %v596_v40 }
 0x1e9   :  { %v681_v18 = vadd.f32 %v680_v16, %v652_v49 }
 0x1ec   :  { %v625_v51 = vpop.f32.mrf.mxu2 }
 0x1ed   :  { %v626_v56 = vadd.f32 %v625_v51, %v597_v38 }
 0x1ee   :  { %v706_v47 = vpop.f32.mrf.mxu1 }
 0x1ef   :  { %v707_v48 = vadd.f32 %v706_v47, %v678_v45  ;;  %v655_v59 = vadd.f32 %v654_v58, %v626_v56 }
 0x1f1   :  { %v716_v50 = vmax.f32 %v707_v48, 0.0  ;;  %v684_v62 = vadd.f32 %v683_v23, %v655_v59 }
 0x1f3   :  { %v720_v52 = vmul.f32 %v716_v50, %v1048_v24  ;;  %v857_v24 = vld [vmem:[%s1253_s7] ss:$0 sm:$0xff] }
 0x1f5   :  { %762 = vmatmul.f32.gmra.mxu2 %v720_v52 }
 0x1f6   :  { %v709_v57 = vpop.f32.mrf.mxu1 }
 0x1f7   :  { %v710_v55 = vadd.f32 %v709_v57, %v681_v18 }
 0x1f9   :  { %v717_v60 = vmax.f32 %v710_v55, 0.0 }
 0x1fb   :  { %v721_v61 = vmul.f32 %v717_v60, %v1050_v26 }
 0x1fd   :  { %765 = vmatmul.f32.gmra.mxu2 %v721_v61 }
 0x1fe   :  { %v712_v63 = vpop.f32.mrf.mxu1 }
 0x1ff   :  { %v713_v0 = vadd.f32 %v712_v63, %v684_v62 }
 0x201   :  { %v718_v1 = vmax.f32 %v713_v0, 0.0 }
 0x203   :  { %v722_v2 = vmul.f32 %v718_v1, %v1063_v36 }
 0x205   :  { %768 = vmatmul.f32.gmra.mxu2 %v722_v2 }
 0x269   :  { %v760_v3 = vpop.f32.mrf.mxu2 }
 0x26a   :  { %v761_v4 = vadd.f32 %v857_v24, %v760_v3 }
 0x26c   :  { %772 = vst [vmem:[#allocation7] sm:$0xff] %v761_v4 }
 0x278   :  { %v763_v5 = vpop.f32.mrf.mxu2 }
 0x279   :  { %v764_v53 = vadd.f32 %v857_v24, %v763_v5 }
 0x27b   :  { %773 = vst [vmem:[#allocation7 + $0x8] sm:$0xff] %v764_v53 }
 0x280   :  { %v766_v22 = vpop.f32.mrf.mxu2 }
 0x281   :  { %v767_v26 = vadd.f32 %v857_v24, %v766_v22 }
 0x283   :  { %774 = vst [vmem:[#allocation7 + $0x10] sm:$0xff] %v767_v26 }
 0x288   :  { %v769_v36 = vpop.f32.mrf.mxu2 }
 0x289   :  { %v770_v7 = vadd.f32 %v857_v24, %v769_v36 }
 0x28b   :  { %775 = vst [vmem:[#allocation7 + $0x18] sm:$0xff] %v770_v7 }
 0x28c   :  { %788 = dma.vmem_to_hbm [thread:$0]  %s781_s21, 512, %s783_s24, [#allocation4], %s937_s13, %s937_s13, %s938_s14  }
 0x28d   :  { %934 = dma.done.wait [#allocation4], 512  }
 0x28e   :  { %935 = vsyncadd [#allocation4], 4294966784 }
 0x28f   :  { %793 = vsyncpa [#allocation3], 1 }
 0x290   :  { %794 = vsyncpa [#allocation6], 1 }
 0x291   :  { %795 = vsyncpa [#allocation4], 1 }

</bundles_post_ra>
